<compile_context>
chip_gen: v7x
topology: tpu7x:2x2x1
jax: 0.10.0
libtpu: 0.0.40
codegen_flags: <defaults>
</compile_context>

<pallas_src>
import jax
import jax.numpy as jnp
import numpy as np
from jax.experimental import pallas as pl
from jax.experimental.pallas import tpu as pltpu


def _round_up(x, m):
    return ((x + m - 1) // m) * m


def _ot_c3_kernel(ot_ref, y_ref, x_ref, out_ref, acc_ref):
    """Grid (i over source tiles [parallel], k over K tiles [parallel],
             j over target tiles [arbitrary, innermost contraction]).

       ot_ref  (tile_s, tile_n)  bf16 : OT plan tile (zero on padded rows/cols)
       y_ref   (tile_n, tile_k)  bf16 : target flattened, natural (n_t, K) layout
       x_ref   (tile_s, tile_k)  f32  : src[i] @ DTW[label_i] flattened (weight)
       out_ref (8, 128)          f32  : lane-dense partial sum per (i, k) tile
       acc_ref (tile_s, tile_k)  f32  : Z = OT @ y accumulator, resident across j
    """
    j = pl.program_id(2)
    tile_s, tile_k = acc_ref.shape

    @pl.when(j == 0)
    def _():
        acc_ref[...] = jnp.zeros_like(acc_ref)

    # MXU matmul: contraction over the (large) target dimension, f32 accumulate.
    acc_ref[...] += jnp.dot(ot_ref[...], y_ref[...],
                            preferred_element_type=jnp.float32)

    @pl.when(j == pl.num_programs(2) - 1)
    def _():
        # Finalize: weight by x (f32) and fold to a lane-dense (8, 128) partial.
        w = x_ref[...] * acc_ref[...]                       # (tile_s, tile_k) f32
        folded = w[:, 0:128]
        for g in range(1, tile_k // 128):                   # lane-group fold
            folded = folded + w[:, g * 128:(g + 1) * 128]
        r = folded[0:8, :]
        for g in range(1, tile_s // 8):                     # sublane-group fold
            r = r + folded[g * 8:(g + 1) * 8, :]
        out_ref[...] = r                                    # lane-dense store


def mad_loss_forward(out_conv_source, out_conv_target, labels_source,
                     similarity_CE, OT, DTW, alpha, beta, num_class=None,
                     tile_s=512, tile_n=512, tile_k=1024,
                     matmul_dtype=jnp.bfloat16):
    n_s, C, T_s = out_conv_source.shape
    n_t, _, T_t = out_conv_target.shape
    K = C * T_t
    f32 = jnp.float32

    src = out_conv_source.astype(f32)
    tgt = out_conv_target.astype(f32)
    labels = labels_source.astype(jnp.int32)
    OT = OT.astype(f32)
    sim = similarity_CE.astype(f32)
    DTW = DTW.astype(f32)

    # ---- wrapper glue: class-conditioned alignment & squared-norm terms ----
    rowsum = DTW.sum(axis=2)                                    # (n_class, T_s)
    colsum = DTW.sum(axis=1)                                    # (n_class, T_t)
    dtw_i = DTW[labels]                                         # (n_s, T_s, T_t)
    x = jnp.einsum('nct,ntu->ncu', src, dtw_i,
                   precision=jax.lax.Precision.HIGHEST).reshape(n_s, K)
    y = tgt.reshape(n_t, K)                                     # natural layout, no transpose

    # C1 / C2 via exact f32 elementwise reductions (cheap, no MXU needed).
    c1 = (src ** 2 * rowsum[labels][:, None, :]).sum(axis=(1, 2))      # (n_s,)
    tgt_sq_t = (tgt ** 2).sum(axis=1)                                   # (n_t, T_t)
    c2c = (tgt_sq_t[None, :, :] * colsum[:, None, :]).sum(-1)           # (n_class, n_t)
    c2 = c2c[labels]                                                    # (n_s, n_t)
    s12 = jnp.sum(OT * (c1[:, None] + c2))                              # sum(OT*(C1+C2))
    s_beta = jnp.sum(OT * sim)                                          # beta term

    # ---- tile selection (VMEM-bounded on all generations; caps for small probs) ----
    tile_s = max(16, (tile_s // 16) * 16)
    tile_n = max(128, (tile_n // 128) * 128)
    tile_k = max(128, (tile_k // 128) * 128)
    tile_s = min(tile_s, _round_up(n_s, 16))
    tile_n = min(tile_n, _round_up(n_t, 128))
    tile_k = min(tile_k, _round_up(K, 128))
    # Guards for the static lane/sublane folds inside the kernel.
    assert tile_s % 16 == 0 and tile_s % 8 == 0
    assert tile_n % 128 == 0
    assert tile_k % 128 == 0

    ns_pad = _round_up(n_s, tile_s)
    nt_pad = _round_up(n_t, tile_n)
    k_pad = _round_up(K, tile_k)
    ns_tiles = ns_pad // tile_s
    nt_tiles = nt_pad // tile_n
    k_tiles = k_pad // tile_k

    # Padded rows/cols carry zeros (OT zero rows/cols, y/x zero rows/cols),
    # so padding contributes exactly 0 to the reduction.
    ot_p = jnp.pad(OT.astype(matmul_dtype), ((0, ns_pad - n_s), (0, nt_pad - n_t)))
    y_p = jnp.pad(y.astype(matmul_dtype), ((0, nt_pad - n_t), (0, k_pad - K)))
    x_p = jnp.pad(x, ((0, ns_pad - n_s), (0, k_pad - K)))

    partials = pl.pallas_call(
        _ot_c3_kernel,
        out_shape=jax.ShapeDtypeStruct((ns_tiles * k_tiles * 8, 128), f32),
        grid_spec=pltpu.PrefetchScalarGridSpec(
            num_scalar_prefetch=0,
            grid=(ns_tiles, k_tiles, nt_tiles),
            in_specs=[
                pl.BlockSpec((tile_s, tile_n), lambda i, k, j: (i, j)),   # OT (bf16)
                pl.BlockSpec((tile_n, tile_k), lambda i, k, j: (j, k)),   # y  (bf16)
                pl.BlockSpec((tile_s, tile_k), lambda i, k, j: (i, k)),   # x  (f32)
            ],
            out_specs=pl.BlockSpec((8, 128),
                                   lambda i, k, j: (i * k_tiles + k, 0)),
            scratch_shapes=[pltpu.VMEM((tile_s, tile_k), f32)],
        ),
        compiler_params=pltpu.CompilerParams(
            dimension_semantics=("parallel", "parallel", "arbitrary"),
            vmem_limit_bytes=32 * 1024 * 1024),
    )(ot_p, y_p, x_p)

    s3 = jnp.sum(partials)                                      # sum(OT * C3)
    length = (T_s + T_t) / 2.0
    alpha_loss = alpha * (s12 - 2.0 * s3) / length
    beta_loss = beta * s_beta
    return alpha_loss, beta_loss


if __name__ == "__main__":
    key = jax.random.PRNGKey(0)
    n_s, n_t, C, T_s, T_t = 40, 200, 8, 16, 24
    num_class = 3
    alpha, beta = 1.0, 0.5

    k1, k2, k3, k4 = jax.random.split(key, 4)
    src = jax.random.normal(k1, (n_s, C, T_s), jnp.float32)
    tgt = jax.random.normal(k2, (n_t, C, T_t), jnp.float32)
    labels = jax.random.randint(k3, (n_s,), 0, num_class, dtype=jnp.int32)
    sim = jax.random.uniform(k4, (n_s, n_t), jnp.float32)

    # Deterministic synthetic MAD-solver state (see TODO(synk) above):
    # uniform OT plan and diagonal DTW alignment path per class.
    OT = jnp.full((n_s, n_t), 1.0 / (n_s * n_t), jnp.float32)
    DTW = jnp.tile(jnp.eye(T_s, T_t, dtype=jnp.float32)[None],
                   (num_class, 1, 1))

    # Call 1: small tiles so the (3, 2, 2) grid exercises padding, both
    # parallel axes, and the accumulated target (contraction) axis.
    a1, b1 = mad_loss_forward(src, tgt, labels, sim, OT, DTW,
                              alpha, beta, num_class,
                              tile_s=16, tile_n=128, tile_k=128)
    # Call 2: default tiles collapse the small problem to a single grid step
    # (whole padded problem resident in VMEM, no pipelining overhead).
    a2, b2 = mad_loss_forward(src, tgt, labels, sim, OT, DTW,
                              alpha, beta, num_class)
    jax.block_until_ready((a1, b1, a2, b2))

    # Pure-numpy reference of l2_torch + the forward tail (validation).
    src_n, tgt_n = np.asarray(src), np.asarray(tgt)
    lab_n, sim_n = np.asarray(labels), np.asarray(sim)
    OT_n, DTW_n = np.asarray(OT), np.asarray(DTW)
    glob = np.zeros((n_s, n_t), np.float32)
    for cl in range(num_class):
        idx = np.where(lab_n == cl)[0]
        if idx.size == 0:
            continue
        pi = DTW_n[cl]
        C1 = ((src_n[idx] ** 2) @ pi.sum(1)).sum(-1)
        C2 = ((tgt_n ** 2) @ pi.T.sum(1)).sum(-1)
        C3 = np.tensordot(src_n[idx] @ pi, tgt_n, axes=([1, 2], [1, 2]))
        glob[idx] = C1[:, None] + C2[None, :] - 2.0 * C3
    ref_a = alpha * (OT_n * glob).sum() / ((T_s + T_t) / 2.0)
    ref_b = beta * (OT_n * sim_n).sum()

    # bf16 streaming of the OT@y operands (f32 accumulation) -> relaxed rtol
    # for the alpha term; beta term is exact f32.
    np.testing.assert_allclose(float(a1), ref_a, rtol=1e-2, atol=1e-2)
    np.testing.assert_allclose(float(a2), ref_a, rtol=1e-2, atol=1e-2)
    np.testing.assert_allclose(float(b1), ref_b, rtol=1e-5, atol=1e-6)
    np.testing.assert_allclose(float(b2), ref_b, rtol=1e-5, atol=1e-6)
    print("KERNEL_OK")
</pallas_src>

<mosaic_0001>
module attributes {stable_mosaic.version = 11 : i64} {
  func.func @_ot_c3_kernel(%arg0: i32, %arg1: i32, %arg2: i32, %arg3: memref<16x128xbf16, #tpu.memory_space<vmem>>, %arg4: memref<128x128xbf16, #tpu.memory_space<vmem>>, %arg5: memref<16x128xf32, #tpu.memory_space<vmem>>, %arg6: memref<8x128xf32, #tpu.memory_space<vmem>>, %arg7: memref<16x128xf32, #tpu.memory_space<vmem>>) attributes {dimension_semantics = [#tpu.dimension_semantics<parallel>, #tpu.dimension_semantics<parallel>, #tpu.dimension_semantics<arbitrary>], iteration_bounds = array<i64: 3, 2, 2>, scalar_prefetch = 0 : i64, scratch_operands = 1 : i64, tpu.core_type = #tpu.core_type<tc>, window_params = [{transform_indices = @transform_0, window_bounds = array<i64: 16, 128>}, {transform_indices = @transform_1, window_bounds = array<i64: 128, 128>}, {transform_indices = @transform_2, window_bounds = array<i64: 16, 128>}, {transform_indices = @transform_3, window_bounds = array<i64: 8, 128>}]} {
    %c0_i32 = arith.constant 0 : i32
    %0 = arith.cmpi eq, %arg2, %c0_i32 : i32
    %1 = arith.extui %0 : i1 to i32
    %c0_i32_0 = arith.constant 0 : i32
    %2 = arith.cmpi ne, %1, %c0_i32_0 : i32
    scf.if %2 {
      %cst_9 = arith.constant 0.000000e+00 : f32
      %12 = vector.broadcast %cst_9 : f32 to vector<16x128xf32>
      %c0_10 = arith.constant 0 : index
      %c0_11 = arith.constant 0 : index
      %13 = vector.load %arg7[%c0_10, %c0_11] : memref<16x128xf32, #tpu.memory_space<vmem>>, vector<16x128xf32>
      tpu.vector_store %arg7[%c0_10, %c0_11], %12 {strides = array<i32>} : memref<16x128xf32, #tpu.memory_space<vmem>>, vector<16x128xf32>,
    } else {
    }
    %c0 = arith.constant 0 : index
    %c0_1 = arith.constant 0 : index
    %3 = vector.load %arg7[%c0, %c0_1] : memref<16x128xf32, #tpu.memory_space<vmem>>, vector<16x128xf32>
    %c0_2 = arith.constant 0 : index
    %c0_3 = arith.constant 0 : index
    %4 = vector.load %arg3[%c0_2, %c0_3] : memref<16x128xbf16, #tpu.memory_space<vmem>>, vector<16x128xbf16>
    %c0_4 = arith.constant 0 : index
    %c0_5 = arith.constant 0 : index
    %5 = vector.load %arg4[%c0_4, %c0_5] : memref<128x128xbf16, #tpu.memory_space<vmem>>, vector<128x128xbf16>
    %cst = arith.constant dense<0.000000e+00> : vector<16x128xf32>
    %6 = tpu.matmul %4, %5, %cst {dimension_numbers = #tpu.dot_dimension_numbers<[1], [0], [0], [1], [0, 0, 1, 1], [], []>} : vector<16x128xbf16>, vector<128x128xbf16>, vector<16x128xf32> -> vector<16x128xf32>
    %7 = arith.addf %3, %6 : vector<16x128xf32>
    %c0_6 = arith.constant 0 : index
    %c0_7 = arith.constant 0 : index
    %8 = vector.load %arg7[%c0_6, %c0_7] : memref<16x128xf32, #tpu.memory_space<vmem>>, vector<16x128xf32>
    tpu.vector_store %arg7[%c0_6, %c0_7], %7 {strides = array<i32>} : memref<16x128xf32, #tpu.memory_space<vmem>>, vector<16x128xf32>,
    %c1_i32 = arith.constant 1 : i32
    %9 = arith.cmpi eq, %arg2, %c1_i32 : i32
    %10 = arith.extui %9 : i1 to i32
    %c0_i32_8 = arith.constant 0 : i32
    %11 = arith.cmpi ne, %10, %c0_i32_8 : i32
    scf.if %11 {
      %c0_9 = arith.constant 0 : index
      %c0_10 = arith.constant 0 : index
      %12 = vector.load %arg5[%c0_9, %c0_10] : memref<16x128xf32, #tpu.memory_space<vmem>>, vector<16x128xf32>
      %c0_11 = arith.constant 0 : index
      %c0_12 = arith.constant 0 : index
      %13 = vector.load %arg7[%c0_11, %c0_12] : memref<16x128xf32, #tpu.memory_space<vmem>>, vector<16x128xf32>
      %14 = arith.mulf %12, %13 : vector<16x128xf32>
      %15 = vector.extract_strided_slice %14 {offsets = [0, 0], sizes = [8, 128], strides = [1, 1]} : vector<16x128xf32> to vector<8x128xf32>
      %16 = vector.extract_strided_slice %14 {offsets = [8, 0], sizes = [8, 128], strides = [1, 1]} : vector<16x128xf32> to vector<8x128xf32>
      %17 = arith.addf %15, %16 : vector<8x128xf32>
      %c0_13 = arith.constant 0 : index
      %c0_14 = arith.constant 0 : index
      %18 = vector.load %arg6[%c0_13, %c0_14] : memref<8x128xf32, #tpu.memory_space<vmem>>, vector<8x128xf32>
      tpu.vector_store %arg6[%c0_13, %c0_14], %17 {strides = array<i32>} : memref<8x128xf32, #tpu.memory_space<vmem>>, vector<8x128xf32>,
    } else {
    }
    return
  }
  func.func @transform_0(%arg0: i32, %arg1: i32, %arg2: i32) -> (i32, i32) {
    %c0_i32 = arith.constant 0 : i32
    return %arg0, %arg2 : i32, i32
  }
  func.func @transform_1(%arg0: i32, %arg1: i32, %arg2: i32) -> (i32, i32) {
    %c0_i32 = arith.constant 0 : i32
    return %arg2, %arg1 : i32, i32
  }
  func.func @transform_2(%arg0: i32, %arg1: i32, %arg2: i32) -> (i32, i32) {
    %c0_i32 = arith.constant 0 : i32
    return %arg0, %arg1 : i32, i32
  }
  func.func @transform_3(%arg0: i32, %arg1: i32, %arg2: i32) -> (i32, i32) {
    %c2_i32 = arith.constant 2 : i32
    %0 = arith.muli %arg0, %c2_i32 : i32
    %1 = arith.addi %0, %arg1 : i32
    %c0_i32 = arith.constant 0 : i32
    %c0_i32_0 = arith.constant 0 : i32
    return %1, %c0_i32 : i32, i32
  }
}

</mosaic_0001>

<bundles_post_ra>
// kernel: tpu_custom_call.1
= control target key start
LH: loop header
LB: loop body
LE: loop exit
PB: predicated region body
PF: predicated region fallthrough
CT: control target
= control target key end

     0   :  { %s1698_s0 = inlined_call_operand.hbm [shape: bf16[48,256], index: 0, kind: input, shape index: {}]   ;;  %s1699_s1 = inlined_call_operand.hbm [shape: bf16[256,256], index: 1, kind: input, shape index: {}]   ;;  %s1700_s2 = inlined_call_operand.hbm [shape: f32[48,256], index: 2, kind: input, shape index: {}]   ;;  %s1701_s3 = inlined_call_operand.hbm [shape: f32[48,128], index: 3, kind: output, shape index: {}]  }
   0x1   :  { %1732 = sst [smem:[#allocation32_spill]] %s1698_s0 }
   0x2   :  { %1733 = sst [smem:[#allocation33_spill]] %s1699_s1 }
   0x3   :  { %1734 = sst [smem:[#allocation34_spill]] %s1700_s2 }
   0x4   :  { %1735 = sst [smem:[#allocation35_spill]] %s1701_s3 }
   0x5   :  { %8 = vsyncpa [#allocation4], 0 }
   0x6   :  { %10 = vsyncpa [#allocation4 + $0x1], 0 }
   0x7   :  { %11 = vsyncpa [#allocation7], 0 }
   0x8   :  { %13 = vsyncpa [#allocation7 + $0x1], 0 }
   0x9   :  { %14 = vsyncpa [#allocation5], 0 }
   0xa   :  { %16 = vsyncpa [#allocation5 + $0x1], 0  ;;  %s1180_s12 = smov 0   ;;  %s1182_s13 = smov 0  }
   0xb   :  { %s1184_s14 = smov 0   ;;  %s1186_s15 = smov 0  }
   0xc   :  { %s1188_s16 = smov 0   ;;  %s1190_s17 = smov 0  }
   0xd   :  { %s1192_s18 = smov 0   ;;  %s1194_s19 = smov 0  }
   0xe   :  { %s1196_s20 = smov 0   ;;  %s1198_s21 = smov 0  }
   0xf   :  { %s1200_s22 = smov 0   ;;  %s1202_s23 = smov 0  }
  0x10   :  { %s1204_s24 = smov 0   ;;  %s1206_s25 = smov 0  }
  0x11   :  { %s1208_s26 = smov 0   ;;  %s1210_s27 = smov 0  }
  0x12   :  { %s1212_s28 = smov 0   ;;  %s1214_s29 = smov 0  }
  0x13   :  { %s1216_s30 = smov 0  }
  0x14 LB: > { %1736 = sst [smem:[#allocation14_spill]] %s1074_s12  ;;  %s1276_s4 = sadd.s32 4294967295, %s1146_s30   ;;  %s1146_s30 = sphi %s1216_s30, %s22_s30   ;;  %s1142_s29 = sphi %s1214_s29, %s1829_s29   ;;  %s1138_s28 = sphi %s1212_s28, %s1828_s28   ;;  %s1134_s27 = sphi %s1210_s27, %s1827_s27   ;;  %s1130_s26 = sphi %s1208_s26, %s1826_s26   ;;  %s1126_s25 = sphi %s1206_s25, %s1825_s25   ;;  %s1122_s24 = sphi %s1204_s24, %s1824_s24   ;;  %s1118_s23 = sphi %s1202_s23, %s1823_s23   ;;  %s1114_s22 = sphi %s1200_s22, %s1822_s22   ;;  %s1110_s21 = sphi %s1198_s21, %s1813_s21   ;;  %s1106_s20 = sphi %s1196_s20, %s1821_s20   ;;  %s1102_s19 = sphi %s1194_s19, %s1820_s19   ;;  %s1098_s18 = sphi %s1192_s18, %s1810_s18   ;;  %s1094_s17 = sphi %s1190_s17, %s1809_s17   ;;  %s1090_s16 = sphi %s1188_s16, %s1808_s16   ;;  %s1086_s15 = sphi %s1186_s15, %s1818_s15   ;;  %s1082_s14 = sphi %s1184_s14, %s1817_s14   ;;  %s1078_s13 = sphi %s1182_s13, %s1815_s13   ;;  %s1074_s12 = sphi %s1180_s12, %s1806_s12  }
  0x15   : > { %1737 = sst [smem:[#allocation15_spill]] %s1078_s13  ;;  %s599_s5 = sadd.s32 4294967294, %s1146_s30  }
  0x16   : > { %1738 = sst [smem:[#allocation16_spill]] %s1086_s15  ;;  %s34_s6 = sadd.s32 1, %s1134_s27 }
  0x17   : > { %1739 = sst [smem:[#allocation17_spill]] %s1090_s16  ;;  %s37_s7 = sadd.s32 1, %s1138_s28 }
  0x18   : > { %1740 = sst [smem:[#allocation18_spill]] %s1094_s17  ;;  %p35_p0 = scmp.ge.s32.totalorder %s34_s6, 2 }
  0x19   : > { %1741 = sst [smem:[#allocation19_spill]] %s1102_s19  ;;  %p1717_p1 = scmp.eq.s32.totalorder %s1146_s30, 0 }
  0x1a   : > { %1742 = sst [smem:[#allocation20_spill]] %s1106_s20  ;;  %p1715_p2 = scmp.eq.s32.totalorder %s1276_s4, 0 }
  0x1b   : > { %1743 = sst [smem:[#allocation21_spill]] %s1114_s22  ;;  %s78_s8 = sadd.s32 1, %s1106_s20 }
  0x1c   : > { %1744 = sst [smem:[#allocation22_spill]] %s1122_s24  ;;  %s1831_s6 = smov (%p35_p0, %s34_s6), 0 }
  0x1d   : > { %1745 = sst [smem:[#allocation23_spill]] %s1126_s25  ;;  %s1833_s7 = smov (!%p35_p0, %s37_s7), %s1138_s28 }
  0x1e   : > { %1746 = sst [smem:[#allocation24_spill]] %s1130_s26  ;;  %s1291_s9 = ssub.s32 %s1134_s27, %s1831_s6 }
  0x1f   : > { %1747 = sst [smem:[#allocation25_spill]] %s1831_s6  ;;  %p85_p3 = scmp.ne.s32.totalorder %s1106_s20, %s1102_s19 }
  0x20   : > { %p1718_p4 = scmp.ge.s32.totalorder %s1833_s7, 2  ;;  %p91_p5 = scmp.ne.s32.totalorder %s1102_s19, %s1098_s18 }
  0x21   : > { %p1300_p6 = por %p85_p3, %p1717_p1  ;;  %p146_p7 = scmp.ne.s32.totalorder %s1082_s14, %s1078_s13 }
  0x22   : > { %s1309_s11 = scalar_select %p1718_p4, 0, %s1833_s7  }
  0x23   : > { %p1313_p8 = por %p91_p5, %p1715_p2  ;;  %p147_p9 = scmp.eq.s32.totalorder %s1276_s4, 11 }
  0x24   : > { %s1320_s18 = ssub.s32 %s1138_s28, %s1309_s11  ;;  %p152_p10 = scmp.ne.s32.totalorder %s1078_s13, %s1074_s12 }
  0x25   : > { %s1749_s6 = scalar_select %p1313_p8, 1, 0 }
  0x26   : > { %s75_s3 = sor.u32 %s1320_s18, %s1291_s9  ;;  %p1326_p11 = por %p147_p9, %p146_p7 }
  0x27   : > { %1750 = sst [smem:[#allocation26_spill]] %s1749_s6  ;;  %p76_p12 = scmp.eq.s32.totalorder %s75_s3, 0 }
  0x28   : > { %s1751_s25 = scalar_select %p1326_p11, 1, 0 }
  0x29   : > { %p153_p13 = scmp.eq.s32.totalorder %s599_s5, 11  ;;  %p1716_p0 = scmp.lt.s32.totalorder %s1146_s30, 12 }
  0x2a   : > { %1752 = sst [smem:[#allocation27_spill]] %s1751_s25  ;;  %s196_s6 = sand.u32 1, %s1146_s30  }
  0x2b   : > { %s1332_s26 = scalar_select %p76_p12, %s1106_s20, %s78_s8  }
  0x2c   : > { %p1334_p3 = por %p153_p13, %p152_p10  ;;  %s198_s12 = sand.u32 1, %s1106_s20  }
  0x2d   : > { %1753 = sst [smem:[#allocation28_spill]] %s1332_s26  ;;  %s608_s13 = sshll.u32 %s198_s12, 6 }
  0x2e   : > { %s1754_s24 = scalar_select %p1334_p3, 1, 0 }
  0x2f   : > { %s638_s19 = sshll.u32 %s1134_s27, 5  ;;  %s200_s15 = scalar_lea.vmem [#allocation6], %s608_s13 }
  0x30   : > { %1755 = sst [smem:[#allocation29_spill]] %s1754_s24  ;;  %s206_s2 = sadd.s32 %s1138_s28, %s638_s19 }
  0x31   : > { %s209_s25 = sshll.u32 %s200_s15, 4  ;;  %s611_s16 = sshll.u32 %s206_s2, 6  ;;  %s1342_s25 = int_to_ptr.vmem [resolvable:$true] %s209_s25 }
  0x32   : > { %s1756_s1 = sld [smem:[#allocation33_spill]]  ;;  %p1353_p5 = pnand %p1716_p0, %p1300_p6 }
  0x33   : > { %s1359_s2 = scalar_lea.sflag [#allocation7], %s196_s6 }
  0x34   : > { %p864_p12 = pneg %p1353_p5 }
  0x38   : > { %s1347_s17 = scalar_lea.hbm %s1756_s1, %s611_s16  ;;  %s867_s19 = scalar_lea.hbm %s1756_s1, 4096 }
  0x39   : > { %s862_s13 = scalar_lea.hbm %s1347_s17, 1024  ;;  %p868_p6 = scmp.lt.u32.totalorder %s1347_s17, %s1756_s1 }
  0x3a   : > { %p863_p10 = scmp.ne.s32.totalorder %s1347_s17, %s862_s13  ;;  %p869_p0 = scmp.lt.u32.totalorder %s867_s19, %s862_s13 }
  0x3b   : > { %p871_p4 = scmp.lt.u32.totalorder %s862_s13, %s1347_s17 }
  0x3c   : > { %p865_p13 = pnand %p864_p12, %p863_p10  ;;  %p870_p1 = por %p869_p0, %p868_p6 }
  0x3e   : > { %p866_p2 = pneg %p865_p13  ;;  %p872_p7 = por %p871_p4, %p870_p1 }
  0x40   : > { %p873_p9 = pnand %p872_p7, %p866_p2 }
  0x42   : > { %876 = shalt.err (!%p873_p9)
}
  0x43   : > { %s877_s6 = scalar_lea.vmem %s1342_s25, 1024  ;;  %s1148_s3 = smov [#allocation6]  }
  0x44   : > { %p878_p10 = scmp.ne.s32.totalorder %s1342_s25, %s877_s6  ;;  %s882_s5 = sshll.u32 %s1148_s3, 4  ;;  %s883_s5 = int_to_ptr.vmem [resolvable:$false] %s882_s5 }
  0x45   : > { %s884_s15 = scalar_lea.vmem %s883_s5, 2048  ;;  %p885_p11 = scmp.lt.s32.totalorder %s1342_s25, %s883_s5 }
  0x46   : > { %p880_p13 = pnand %p878_p10, %p864_p12  ;;  %p886_p0 = scmp.lt.s32.totalorder %s884_s15, %s877_s6 }
  0x48   : > { %p881_p3 = pneg %p880_p13  ;;  %p887_p6 = por %p886_p0, %p885_p11 }
  0x4a   : > { %p888_p1 = pnand %p887_p6, %p881_p3 }
  0x4c   : > { %891 = shalt.err (!%p888_p1)
}
  0x4d   : > { %s1720_s13 = smov 128   ;;  %s1722_s16 = smov 64  }
  0x4e   : > { %s1723_s19 = smov 4   ;;  %p1758_p2 = scmp.lt.s32.totalorder %s1146_s30, 13 }
  0x4f   : > { %683 = dma.hbm_to_vmem [thread:$0]  (!%p1353_p5), %s1347_s17, 1024, %s1342_s25, %s1359_s2, %s1720_s13, %s1722_s16, %s1723_s19  }
  0x50   : > { %p1759_p4 = scmp.ge.s32.totalorder %s1146_s30, 1  ;;  %s41_s10 = sadd.s32 1, %s1142_s29 }
  0x51   : > { %s50_s6 = sadd.s32 1, %s1118_s23  ;;  %p1761_p3 = scmp.ge.s32.totalorder %s1833_s7, 2 }
  0x52   : > { %p1394_p11 = pnand %p1759_p4, %p1758_p2  ;;  %p57_p7 = scmp.ne.s32.totalorder %s1118_s23, %s1114_s22 }
  0x53   : > { %s1835_s10 = smov (!%p1761_p3, %s41_s10), %s1142_s29  ;;  %p63_p9 = scmp.ne.s32.totalorder %s1114_s22, %s1110_s21 }
  0x54   : > { %s1760_s8 = scalar_select %p1394_p11, 1, 0 }
  0x55   : > { %p43_p12 = scmp.ge.s32.totalorder %s1835_s10, 3  ;;  %s600_s12 = sshll.u32 %s1142_s29, 1 }
  0x56   : > { %p1762_p5 = scmp.eq.s32.totalorder %s1146_s30, 0  ;;  %p1764_p13 = scmp.eq.s32.totalorder %s1276_s4, 0 }
  0x57   : > { %s1837_s10 = smov (%p43_p12, %s1835_s10), 0  ;;  %s130_s21 = sadd.s32 %s1138_s28, %s600_s12 }
  0x58   : > { %p1410_p10 = por %p1762_p5, %p57_p7  ;;  %p1416_p0 = por %p1764_p13, %p63_p9 }
  0x59   : > { %1767 = sst [smem:[#allocation31_spill]] %s1837_s10  ;;  %s136_s7 = sadd.s32 1, %s1082_s14 }
  0x5a   : > { %s1765_s25 = scalar_select %p1416_p0, 1, 0 }
  0x5b   : > { %s45_s3 = ssub.s32 %s1142_s29, %s1837_s10  ;;  %s601_s5 = sshll.u32 %s1837_s10, 1 }
  0x5c   : > { %1766 = sst [smem:[#allocation30_spill]] %s1765_s25  ;;  %s47_s15 = sor.u32 %s1291_s9, %s45_s3 }
  0x5d   : > { %s103_s13 = sor.u32 %s1320_s18, %s45_s3  ;;  %p48_p6 = scmp.eq.s32.totalorder %s47_s15, 0 }
  0x5e   : > { %p1429_p1 = scmp.eq.s32.totalorder %s103_s13, 0  ;;  %s132_s19 = sadd.s32 %s601_s5, %s1309_s11 }
  0x5f   : > { %s173_s1 = sand.u32 1, %s1118_s23   ;;  %s133_s20 = ssub.s32 %s130_s21, %s132_s19 }
  0x60   : > { %s1436_s26 = scalar_select %p48_p6, %s1118_s23, %s50_s6  }
  0x61   : > { %p134_p2 = scmp.eq.s32.totalorder %s133_s20, 0  ;;  %s604_s12 = sshll.u32 %s173_s1, 3 }
  0x62   : > { %s637_s24 = sshll.u32 %s1142_s29, 2  ;;  %s177_s18 = scalar_lea.vmem [#allocation3], %s604_s12 }
  0x63   : > { %s1440_s25 = scalar_select %p134_p2, %s1082_s14, %s136_s7  }
  0x64   : > { %s183_s9 = sadd.s32 %s1134_s27, %s637_s24  ;;  %s186_s3 = sshll.u32 %s177_s18, 4  ;;  %s1443_s3 = int_to_ptr.vmem [resolvable:$true] %s186_s3 }
  0x65   : > { %s607_s15 = sshll.u32 %s183_s9, 6  ;;  %s1769_s0 = sld [smem:[#allocation32_spill]] }
  0x66   : > { %p1770_p4 = scmp.lt.s32.totalorder %s1146_s30, 12  ;;  %s1459_s19 = sadd.s32 %s1138_s28, %s637_s24 }
  0x67   : > { %s615_s6 = sshll.u32 %s1459_s19, 7  ;;  %s1462_s21 = scalar_lea.sflag [#allocation4], %s173_s1 }
  0x68   : > { %p1454_p3 = pnand %p1770_p4, %p1410_p10 }
  0x6a   : > { %p894_p9 = pneg %p1454_p3 }
  0x6b   : > { %s1448_s22 = scalar_lea.hbm %s1769_s0, %s607_s15  ;;  %s897_s5 = scalar_lea.hbm %s1769_s0, 768 }
  0x6c   : > { %s892_s10 = scalar_lea.hbm %s1448_s22, 128  ;;  %p898_p10 = scmp.lt.u32.totalorder %s1448_s22, %s1769_s0 }
  0x6d   : > { %p893_p7 = scmp.ne.s32.totalorder %s1448_s22, %s892_s10  ;;  %p899_p13 = scmp.lt.u32.totalorder %s897_s5, %s892_s10 }
  0x6e   : > { %p901_p2 = scmp.lt.u32.totalorder %s892_s10, %s1448_s22 }
  0x6f   : > { %p895_p12 = pnand %p894_p9, %p893_p7  ;;  %p900_p6 = por %p899_p13, %p898_p10 }
  0x71   : > { %p896_p5 = pneg %p895_p12  ;;  %p902_p4 = por %p901_p2, %p900_p6 }
  0x73   : > { %p903_p8 = pnand %p902_p4, %p896_p5 }
  0x75   : > { %906 = shalt.err (!%p903_p8)
}
  0x76   : > { %s907_s1 = scalar_lea.vmem %s1443_s3, 128  ;;  %s1152_s24 = smov [#allocation3]  }
  0x77   : > { %p908_p7 = scmp.ne.s32.totalorder %s1443_s3, %s907_s1  ;;  %s912_s18 = sshll.u32 %s1152_s24, 4  ;;  %s913_s18 = int_to_ptr.vmem [resolvable:$false] %s912_s18 }
  0x78   : > { %s914_s15 = scalar_lea.vmem %s913_s18, 256  ;;  %p915_p11 = scmp.lt.s32.totalorder %s1443_s3, %s913_s18 }
  0x79   : > { %p910_p12 = pnand %p908_p7, %p894_p9  ;;  %p916_p10 = scmp.lt.s32.totalorder %s914_s15, %s907_s1 }
  0x7b   : > { %p911_p0 = pneg %p910_p12  ;;  %p917_p13 = por %p916_p10, %p915_p11 }
  0x7d   : > { %p918_p6 = pnand %p917_p13, %p911_p0 }
  0x7f   : > { %921 = shalt.err (!%p918_p6)
}
  0x80   : > { %s1772_s13 = smov 4   ;;  %s1773_s10 = smov 64  }
  0x81   : > { %s1774_s17 = smov 128   ;;  %s1775_s7 = sld [smem:[#allocation18_spill]] }
  0x82   : > { %s1776_s5 = sld [smem:[#allocation17_spill]]  ;;  %s1777_s12 = sld [smem:[#allocation16_spill]] }
  0x83   : > { %680 = dma.hbm_to_vmem [thread:$0]  (!%p1454_p3), %s1448_s22, 128, %s1443_s3, %s1462_s21, %s1774_s17, %s1773_s10, %s1772_s13  }
  0x84   : > { %s1778_s1 = sld [smem:[#allocation34_spill]]  ;;  %p1779_p11 = scmp.eq.s32.totalorder %s1146_s30, 0 }
  0x85   : > { %p1780_p5 = scmp.eq.s32.totalorder %s1276_s4, 0  ;;  %p1782_p2 = scmp.lt.s32.totalorder %s1146_s30, 12 }
  0x87   : > { %s106_s18 = sadd.s32 1, %s1775_s7  ;;  %s221_s0 = sand.u32 1, %s1775_s7  }
  0x88   : > { %p113_p8 = scmp.ne.s32.totalorder %s1775_s7, %s1776_s5  ;;  %p119_p9 = scmp.ne.s32.totalorder %s1776_s5, %s1777_s12 }
  0x89   : > { %s1506_s15 = scalar_select %p1429_p1, %s1775_s7, %s106_s18  }
  0x8a   : > { %s1498_s24 = scalar_lea.hbm %s1778_s1, %s615_s6  ;;  %p115_p0 = por %p113_p8, %p1779_p11 }
  0x8b   : > { %p1515_p3 = por %p119_p9, %p1780_p5  ;;  %s612_s3 = sshll.u32 %s221_s0, 4 }
  0x8c   : > { %p1521_p4 = pnand %p1782_p2, %p115_p0  ;;  %s223_s16 = scalar_lea.vmem [#allocation8], %s612_s3 }
  0x8d   : > { %s232_s6 = sshll.u32 %s223_s16, 4  ;;  %s922_s21 = scalar_lea.hbm %s1498_s24, 256  ;;  %s1525_s6 = int_to_ptr.vmem [resolvable:$true] %s232_s6 }
  0x8e   : > { %p923_p1 = scmp.ne.s32.totalorder %s1498_s24, %s922_s21  ;;  %p924_p7 = pneg %p1521_p4 }
  0x8f   : > { %s927_s10 = scalar_lea.hbm %s1778_s1, 1536  ;;  %p928_p13 = scmp.lt.u32.totalorder %s1498_s24, %s1778_s1 }
  0x90   : > { %p925_p12 = pnand %p924_p7, %p923_p1  ;;  %p929_p6 = scmp.lt.u32.totalorder %s927_s10, %s922_s21 }
  0x91   : > { %p931_p11 = scmp.lt.u32.totalorder %s922_s21, %s1498_s24 }
  0x92   : > { %p926_p10 = pneg %p925_p12  ;;  %p930_p8 = por %p929_p6, %p928_p13 }
  0x94   : > { %p932_p0 = por %p931_p11, %p930_p8 }
  0x96   : > { %p933_p9 = pnand %p932_p0, %p926_p10 }
  0x98   : > { %936 = shalt.err (!%p933_p9)
}
  0x99   : > { %s937_s12 = scalar_lea.vmem %s1525_s6, 256  ;;  %s1153_s20 = smov [#allocation8]  }
  0x9a   : > { %p938_p5 = scmp.ne.s32.totalorder %s1525_s6, %s937_s12  ;;  %s942_s9 = sshll.u32 %s1153_s20, 4  ;;  %s943_s9 = int_to_ptr.vmem [resolvable:$false] %s942_s9 }
  0x9b   : > { %s944_s18 = scalar_lea.vmem %s943_s9, 512  ;;  %p945_p12 = scmp.lt.s32.totalorder %s1525_s6, %s943_s9 }
  0x9c   : > { %p940_p2 = pnand %p938_p5, %p924_p7  ;;  %p946_p13 = scmp.lt.s32.totalorder %s944_s18, %s937_s12 }
  0x9e   : > { %p941_p1 = pneg %p940_p2  ;;  %p947_p6 = por %p946_p13, %p945_p12 }
  0xa0   : > { %p948_p8 = pnand %p947_p6, %p941_p1 }
  0xa2   : > { %951 = shalt.err (!%p948_p8)
}
  0xa3   : > { %s1154_s3 = smov 256   ;;  %s1155_s16 = smov 8  }
  0xa4   : > { %686 = dma.hbm_to_vmem [thread:$0]  (!%p1521_p4), %s1498_s24, 256, %s1525_s6, %s1359_s2, %s1154_s3, %s1774_s17, %s1155_s16  }
  0xa5   : > { %p1784_p7 = scmp.ne.s32.totalorder %s1760_s8, 0 }
  0xa6   : > { %s1785_s21 = sld [smem:[#allocation21_spill]] (!%p1784_p7)  ;;  %s1786_s0 = sld [smem:[#allocation30_spill]] (!%p1784_p7) }
  0xa7   : > { %244 = sbr.rel (%p1784_p7) target bundleno = 501 (0x1f5), region = 32 }
  0xac   : > { %s246_s13 = sand.u32 (!%p1784_p7), 1, %s1785_s21   ;;  %p1787_p10 = scmp.ne.s32.totalorder (!%p1784_p7), %s1786_s0, 0 }
  0xad   : > { %s1557_s10 = sshll.u32 (!%p1784_p7), %s246_s13, 3  ;;  %s247_s7 = scalar_lea.sflag (!%p1784_p7), [#allocation4], %s246_s13 }
  0xae   : > { %s250_s5 = scalar_lea.vmem [#allocation3], %s1557_s10 }
  0xaf   : > { %1057 = dma.done.wait (%p1787_p10), %s247_s7, 128  }
  0xb0   : > { %1059 = vsyncadd (%p1787_p10), %s247_s7, 4294967168  ;;  %s1788_s19 = sld [smem:[#allocation19_spill]]  ;;  %s1789_s12 = sld [smem:[#allocation26_spill]] }
  0xb1   : > { %s255_s2 = sand.u32 1, %s1276_s4  }
  0xb2   : > { %s256_s24 = scalar_lea.sflag [#allocation7], %s255_s2 }
  0xb6   : > { %s257_s17 = sand.u32 1, %s1788_s19   ;;  %p1790_p4 = scmp.ne.s32.totalorder %s1789_s12, 0 }
  0xb7   : > { %s618_s8 = sshll.u32 %s257_s17, 6 }
  0xb8   : > { %s1566_s6 = scalar_lea.vmem [#allocation6], %s618_s8 }
  0xb9   : > { %1061 = dma.done.wait (%p1790_p4), %s256_s24, 1024  }
  0xba   : > { %1063 = vsyncadd (%p1790_p4), %s256_s24, 4294966272  ;;  %s1791_s20 = sld [smem:[#allocation17_spill]] }
  0xc0   : > { %s266_s9 = sand.u32 1, %s1791_s20  }
  0xc1   : > { %s1573_s18 = sshll.u32 %s266_s9, 4 }
  0xc2   : > { %s268_s3 = scalar_lea.vmem [#allocation8], %s1573_s18 }
  0xc3   : > { %1065 = dma.done.wait (%p1515_p3), %s256_s24, 256  }
  0xc4   : > { %1067 = vsyncadd (%p1515_p3), %s256_s24, 4294967040  ;;  %s1792_s4 = sld [smem:[#allocation15_spill]]  ;;  %s1793_s13 = sld [smem:[#allocation22_spill]] }
  0xca   : > { %s298_s16 = sand.u32 1, %s1792_s4   ;;  %p621_p11 = scmp.ne.s32.totalorder %s1793_s13, 0 }
  0xcb   : > { %s1583_s21 = sshll.u32 %s298_s16, 3  ;;  %v1156_v0 = vmov (!%p621_p11), 0.0  }
  0xcc   : > { %s300_s0 = scalar_lea.vmem [#allocation9], %s1583_s21  ;;  %310 = sbr.rel (%p621_p11) target bundleno = 211 (0xd3), region = 48  ;;  %311 = vst [vmem:[#allocation2] sm:$0xff] (!%p621_p11), %v1156_v0  ;;  %312 = vst [vmem:[#allocation2 + $0x8] sm:$0xff] (!%p621_p11), %v1156_v0 }
  0xd3 PF: > { %v853_v1 = vld [vmem:[%s1566_s6] sm:$0xff]   ;;  %v1157_v2 = vmov 0.0   ;;  %v854_v3 = vld [vmem:[%s1566_s6 + $0x8] sm:$0xff]   ;;  %vm1158_vm0 = vmmov 0   ;;  %v855_v4 = vld [vmem:[%s1566_s6 + $0x10] sm:$0xff]   ;;  %s1794_s22 = sld [smem:[#allocation22_spill]] }
  0xd4   : > { %649 = vmatprep.subr.bf16.mxu0 %v1157_v2  ;;  %665 = vmatprep.mubr.msk.bf16.mxu0 %vm1158_vm0, %v1157_v2  ;;  %v856_v5 = vld [vmem:[%s1566_s6 + $0x18] sm:$0xff]   ;;  %v857_v6 = vld [vmem:[%s1566_s6 + $0x20] sm:$0xff]   ;;  %v858_v7 = vld [vmem:[%s1566_s6 + $0x28] sm:$0xff]  }
  0xd5   : > { %650 = vmatpush3.bf16.msra.mxu0 %v853_v1  ;;  %v859_v8 = vld [vmem:[%s1566_s6 + $0x30] sm:$0xff]   ;;  %v860_v9 = vld [vmem:[%s1566_s6 + $0x38] sm:$0xff]   ;;  %v313_v11 = vld [vmem:[#allocation2] sm:$0xff] }
  0xd6   : > { %651 = vmatprep.subr.bf16.mxu0 %v1157_v2  ;;  %v861_v10 = vld [vmem:[%s250_s5] sm:$0xff]   ;;  %v314_v13 = vld [vmem:[#allocation2 + $0x8] sm:$0xff] }
  0xd9   : > { %652 = vmatpush3.bf16.msra.mxu0 %v854_v3  ;;  %p631_p3 = scmp.ne.s32.totalorder %s1794_s22, 1 }
  0xda   : > { %653 = vmatprep.subr.bf16.mxu0 %v1157_v2  ;;  %v436_v19 = vld [vmem:[%s268_s3] sm:$0xff] (!%p631_p3)  ;;  %v437_v20 = vld [vmem:[%s268_s3 + $0x8] sm:$0xff] (!%p631_p3) }
  0xdd   : > { %654 = vmatpush3.bf16.msra.mxu0 %v855_v4 }
  0xde   : > { %655 = vmatprep.subr.bf16.mxu0 %v1157_v2 }
  0xe1   : > { %656 = vmatpush3.bf16.msra.mxu0 %v856_v5 }
  0xe2   : > { %657 = vmatprep.subr.bf16.mxu0 %v1157_v2 }
  0xe5   : > { %658 = vmatpush3.bf16.msra.mxu0 %v857_v6 }
  0xe6   : > { %659 = vmatprep.subr.bf16.mxu0 %v1157_v2 }
  0xe9   : > { %660 = vmatpush3.bf16.msra.mxu0 %v858_v7 }
  0xea   : > { %661 = vmatprep.subr.bf16.mxu0 %v1157_v2 }
  0xed   : > { %662 = vmatpush3.bf16.msra.mxu0 %v859_v8 }
  0xee   : > { %663 = vmatprep.subr.bf16.mxu0 %v1157_v2 }
  0xf1   : > { %664 = vmatpush3.bf16.msra.mxu0 %v860_v9 }
  0xf4   : > { %666 = vmatmul.mubr.bf16.vlgmr.msra.gmra.mrb[0].mxu0 %v861_v10 }
 0x1c6   : > { %435 = sbr.rel (%p631_p3) target bundleno = 473 (0x1d9), region = 52 }
 0x1c7   : > { %v421_v12 = vpop.f32.mrb[0].mxu0 }
 0x1c8   : > { %v428_v14 = vadd.f32 %v421_v12, %v313_v11  ;;  %v667_v15 = vpop.f32.mrb[1].mxu0 }
 0x1c9   : > { %v424_v16 = vpop.f32.mrb[2].mxu0 }
 0x1ca   : > { %430 = vst [vmem:[#allocation2] sm:$0xff] %v428_v14  ;;  %v429_v17 = vadd.f32 %v424_v16, %v314_v13  ;;  %v668_v18 = vpop.f32.mrb[3].mxu0 }
 0x1cc   : > { %431 = vst [vmem:[#allocation2 + $0x8] sm:$0xff] %v429_v17 }
 0x1d1   : > { %v438_v21 = vld [vmem:[#allocation2] sm:$0xff] }
 0x1d2   : > { %v440_v23 = vmul.f32 %v438_v21, %v436_v19 }
 0x1d3   : > { %v439_v22 = vld [vmem:[#allocation2 + $0x8] sm:$0xff] }
 0x1d4   : > { %v441_v24 = vmul.f32 %v439_v22, %v437_v20 }
 0x1d6   : > { %v442_v25 = vadd.f32 %v441_v24, %v440_v23 }
 0x1d8   : > { %443 = vst [vmem:[%s300_s0] sm:$0xff] %v442_v25 }
 0x1d9 PF: > { %s1795_s10 = sld [smem:[#allocation24_spill]]  ;;  %s1796_s7 = sld [smem:[#allocation23_spill]] }
 0x1da   : > { %s1798_s19 = sld [smem:[#allocation27_spill]]  ;;  %s460_s17 = sshll.u32 %s300_s0, 4  ;;  %s1608_s17 = int_to_ptr.vmem [resolvable:$true] %s460_s17 }
 0x1db   : > { %s1799_s20 = sld [smem:[#allocation35_spill]]  ;;  %s445_s3 = scalar_lea.sflag [#allocation5], %s298_s16 }
 0x1dc   : > { %s952_s4 = scalar_lea.vmem %s1608_s17, 128  ;;  %s1159_s13 = smov [#allocation9]  }
 0x1dd   : > { %p953_p0 = scmp.ne.s32.totalorder %s1608_s17, %s952_s4  ;;  %s956_s21 = sshll.u32 %s1159_s13, 4  ;;  %s957_s21 = int_to_ptr.vmem [resolvable:$false] %s956_s21 }
 0x1de   : > { %s958_s0 = scalar_lea.vmem %s957_s21, 256  ;;  %p959_p1 = scmp.lt.s32.totalorder %s1608_s17, %s957_s21 }
 0x1df   : > { %s633_s12 = sshll.u32 %s1795_s10, 1  ;;  %p960_p12 = scmp.lt.s32.totalorder %s958_s0, %s952_s4 }
 0x1e0   : > { %s453_s2 = sadd.s32 %s1796_s7, %s633_s12  ;;  %p1801_p9 = scmp.ne.s32.totalorder %s1798_s19, 0 }
 0x1e1   : > { %s634_s8 = sshll.u32 %s453_s2, 7  ;;  %s1800_s9 = smov %s1799_s20 }
 0x1e2   : > { %s458_s18 = scalar_lea.hbm %s1799_s20, %s634_s8  ;;  %p954_p5 = pnand %p953_p0, %p1801_p9 }
 0x1e3   : > { %p961_p13 = por %p960_p12, %p959_p1 }
 0x1e4   : > { %p955_p2 = pneg %p954_p5 }
 0x1e6   : > { %p962_p6 = pnand %p961_p13, %p955_p2 }
 0x1e8   : > { %965 = shalt.err (!%p962_p6)
}
 0x1e9   : > { %s966_s22 = scalar_lea.hbm %s458_s18, 128  ;;  %s970_s7 = scalar_lea.hbm %s1800_s9, 768 }
 0x1ea   : > { %p967_p8 = scmp.ne.s32.totalorder %s458_s18, %s966_s22  ;;  %p971_p4 = scmp.lt.u32.totalorder %s458_s18, %s1800_s9 }
 0x1eb   : > { %p972_p11 = scmp.lt.u32.totalorder %s970_s7, %s966_s22  ;;  %p974_p0 = scmp.lt.u32.totalorder %s966_s22, %s458_s18 }
 0x1ec   : > { %p968_p7 = pnand %p967_p8, %p1801_p9 }
 0x1ed   : > { %p973_p3 = por %p972_p11, %p971_p4 }
 0x1ee   : > { %p969_p10 = pneg %p968_p7 }
 0x1ef   : > { %p975_p5 = por %p974_p0, %p973_p3 }
 0x1f1   : > { %p976_p2 = pnand %p975_p5, %p969_p10 }
 0x1f3   : > { %979 = shalt.err (!%p976_p2)
}
 0x1f4   : > { %675 = dma.vmem_to_hbm [thread:$0]  (%p1801_p9), %s1608_s17, 128, %s458_s18, %s445_s3  }
 0x1f5 PF: > { %s1802_s2 = sld [smem:[#allocation14_spill]]  ;;  %s1803_s8 = sld [smem:[#allocation29_spill]] }
 0x1f6   : > { %p692_p1 = scmp.ge.s32.totalorder %s1146_s30, 2 }
 0x1fb   : > { %s472_s24 = sand.u32 1, %s1802_s2   ;;  %p1804_p12 = scmp.ne.s32.totalorder %s1803_s8, 0 }
 0x1fc   : > { %s473_s6 = scalar_lea.sflag [#allocation5], %s472_s24 }
 0x1fd   : > { %p688_p13 = pnand %p692_p1, %p1804_p12 }
 0x1ff   : > { %1069 = dma.done.wait (!%p688_p13), %s473_s6, 128  }
 0x200   : > { %1071 = vsyncadd (!%p688_p13), %s473_s6, 4294967168  ;;  %s22_s30 = sadd.s32 1, %s1146_s30   ;;  %s1806_s12 = sld [smem:[#allocation15_spill]] }
 0x201   : > { %p1636_p6 = scmp.ge.s32.totalorder %s22_s30, 14   ;;  %s1807_s19 = sld [smem:[#allocation17_spill]] }
 0x202   : > { %s1808_s16 = sld [smem:[#allocation18_spill]]  ;;  %s1809_s17 = smov %s1506_s15 }
 0x203   : > { %s1810_s18 = sld [smem:[#allocation19_spill]]  ;;  %s1811_s3 = sld [smem:[#allocation20_spill]] }
 0x204   : > { %s1812_s4 = sld [smem:[#allocation28_spill]]  ;;  %s1813_s21 = sld [smem:[#allocation21_spill]] }
 0x205   : > { %s1814_s0 = sld [smem:[#allocation25_spill]]  ;;  %s1815_s13 = smov %s1082_s14 }
 0x206   : > { %s1816_s10 = sld [smem:[#allocation31_spill]]  ;;  %s1817_s14 = smov %s1440_s25 }
 0x207   : > { %s1818_s15 = smov %s1807_s19  ;;  %s1822_s22 = smov %s1118_s23 }
 0x208   : > { %s1823_s23 = smov %s1436_s26  ;;  %s1824_s24 = smov %s1134_s27 }
 0x209   : > { %s1820_s19 = smov %s1811_s3  ;;  %s1825_s25 = smov %s1138_s28 }
 0x20a   : > { %s1821_s20 = smov %s1812_s4  ;;  %s1826_s26 = smov %s1142_s29 }
 0x20b   : > { %s1827_s27 = smov %s1814_s0  ;;  %s1828_s28 = smov %s1309_s11 }
 0x20c   : > { %s1829_s29 = smov %s1816_s10  ;;  %21 = sbr.rel (!%p1636_p6) target bundleno = 20 (0x14), region = 109 }
 0x213   :  { %478 = vsyncpa [#allocation4], 1 }
 0x214   :  { %480 = vsyncpa [#allocation4 + $0x1], 1 }
 0x215   :  { %481 = vsyncpa [#allocation7], 1 }
 0x216   :  { %483 = vsyncpa [#allocation7 + $0x1], 1 }
 0x217   :  { %484 = vsyncpa [#allocation5], 1 }
 0x218   :  { %486 = vsyncpa [#allocation5 + $0x1], 1 }

</bundles_post_ra>
